<compile_context>
chip_gen: v7x
topology: tpu7x:2x2x1
jax: 0.10.0
libtpu: 0.0.40
codegen_flags: <defaults>
</compile_context>

<pallas_src>
import functools

import jax
import jax.numpy as jnp
import numpy as np
from jax.experimental import pallas as pl
from jax.experimental.pallas import tpu as pltpu


# ---------------------------------------------------------------------------
# Kernel
# ---------------------------------------------------------------------------
def _ffn_kernel(x_ref, w1_ref, b1_ref, w2_ref, b2_ref, o_ref, *scratch,
                nb, dg, single_f_step, use_scratch_acc):
    """One (row-tile, F-chunk) grid step of the fused position-wise FFN.

    x_ref  : (tm, D)        input rows (VMEM-resident across the F axis)
    w1_ref : (nb, dg, tf)   bf16 first grouped-linear weight chunk
    b1_ref : (nb, tf)       f32 first grouped-linear bias chunk
    w2_ref : (nb, tf, dg)   bf16 second grouped-linear weight chunk
    b2_ref : (nb, dg)       f32 second grouped-linear bias (full)
    o_ref  : (tm, D)        output rows (VMEM-resident across the F axis)
    scratch: optional (tm, D) f32 accumulator (only when o_ref is not f32)
    """
    x = x_ref[...].astype(jnp.bfloat16)   # bf16 feeds the MXU; accumulation stays f32

    if single_f_step:
        # Whole hidden dim in one chunk: straight fused pass, no accumulator
        # bookkeeping, no extra read-modify-write passes over o_ref.
        for g in range(nb):   # nb is static -> unrolled, static slab slices
            xg = x[:, g * dg:(g + 1) * dg]                                    # (tm, dg)
            hg = jnp.dot(xg, w1_ref[g], preferred_element_type=jnp.float32)  # (tm, tf)
            hg = jnp.maximum(hg + b1_ref[g][None, :], 0.0)                    # bias+ReLU
            # Dropout == identity at inference.
            og = jnp.dot(hg.astype(jnp.bfloat16), w2_ref[g],
                         preferred_element_type=jnp.float32)                  # (tm, dg)
            o_ref[:, g * dg:(g + 1) * dg] = (og + b2_ref[g][None, :]).astype(o_ref.dtype)
        return

    # F-chunked reduction path: accumulate directly into the resident output
    # block when it is f32, otherwise into an f32 VMEM scratch.
    acc_ref = scratch[0] if use_scratch_acc else o_ref
    f = pl.program_id(1)
    nf = pl.num_programs(1)

    @pl.when(f == 0)
    def _init():
        acc_ref[...] = jnp.zeros_like(acc_ref)

    for g in range(nb):
        xg = x[:, g * dg:(g + 1) * dg]
        hg = jnp.dot(xg, w1_ref[g], preferred_element_type=jnp.float32)
        hg = jnp.maximum(hg + b1_ref[g][None, :], 0.0)
        acc_ref[:, g * dg:(g + 1) * dg] += jnp.dot(
            hg.astype(jnp.bfloat16), w2_ref[g], preferred_element_type=jnp.float32)

    @pl.when(f == nf - 1)
    def _finalize():
        for g in range(nb):
            o_ref[:, g * dg:(g + 1) * dg] = (
                acc_ref[:, g * dg:(g + 1) * dg] + b2_ref[g][None, :]
            ).astype(o_ref.dtype)


# ---------------------------------------------------------------------------
# Trace-time tile / budget helpers (all shapes static under jit)
# ---------------------------------------------------------------------------
def _round_down(x, m):
    return (x // m) * m


def _vmem_budget_bytes():
    """Per-core VMEM budget with headroom: ~102 MiB on 128-MiB parts (v5e/v6e),
    ~48 MiB on the 64-MiB v7x part."""
    try:
        phys = pltpu.get_tpu_info().vmem_capacity_bytes
    except Exception:                      # conservative fallback (v7x-safe)
        phys = 64 << 20
    return int(max(min(phys - (16 << 20), int(phys * 0.8)), 32 << 20))


def _chunk_weight_bytes(nb, dg, tf):
    """Double-buffered bf16 W1+W2 chunks + f32 b1 chunk + f32 b2."""
    return 2 * (2 * nb * dg * tf * 2 + nb * tf * 4 + nb * dg * 4)


def _choose_f_tile(fg, nb, dg, weight_budget):
    """Largest tf (full fg preferred -> weight residency) whose double-buffered
    chunk fits `weight_budget`; must divide fg and be a multiple of 128 (or fg)."""
    if _chunk_weight_bytes(nb, dg, fg) <= weight_budget:
        return fg                                   # fully VMEM-resident weights
    if fg % 128 == 0:
        tf = _round_down(fg, 128)
        while tf >= 128:
            if fg % tf == 0 and _chunk_weight_bytes(nb, dg, tf) <= weight_budget:
                return tf
            tf -= 128
    # TODO(synk): pad / Element-map awkward hidden sizes; extreme configs only.
    return fg


def _choose_row_tile(rows, d, row_budget, tm_max, itemsize):
    """Full rows if small, else the largest 128-multiple row tile whose
    double-buffered x+out blocks fit `row_budget`."""
    if rows <= tm_max:
        return rows                                 # full dim -> no (8,128) concern
    per_row = 4 * d * itemsize                      # x (2 bufs) + out (2 bufs)
    tm = _round_down(max(row_budget // per_row, 128), 128)
    return int(min(tm_max, max(tm, 128)))


# ---------------------------------------------------------------------------
# Public wrapper
# ---------------------------------------------------------------------------
@functools.partial(jax.jit, static_argnames=("tf_override", "tm_override"))
def positionalwise_ffn(x, w1, b1, w2, b2, *, tf_override=None, tm_override=None):
    """x: (B, T, D).  w1: (nb, D/nb, F/nb), b1: (nb, F/nb),
    w2: (nb, F/nb, D/nb), b2: (nb, D/nb).  Returns (B, T, D)."""
    B, T, D = x.shape
    nb, dg, fg = w1.shape
    assert nb * dg == D

    # permute(1,0,2) -> FFN -> permute(1,0,2) cancels for a position-wise FFN.
    rows = B * T
    xf = x.reshape(rows, D)
    x_item = jnp.dtype(x.dtype).itemsize

    budget = _vmem_budget_bytes()
    tm_max = 1024 if budget <= (56 << 20) else 2048
    min_row_cost = 4 * min(rows, 128) * D * x_item

    # --- hidden-dim chunk (prefer full residency: weights DMA'd once total) ---
    tf = int(tf_override) if tf_override is not None else _choose_f_tile(
        fg, nb, dg, budget - min_row_cost)
    assert fg % tf == 0, f"tf={tf} must divide fg={fg}"
    nf = fg // tf
    weight_cost = _chunk_weight_bytes(nb, dg, tf)

    # --- row tile (weight HBM re-streaming, if any, scales as rows/tm) ---
    tm = int(tm_override) if tm_override is not None else _choose_row_tile(
        rows, D, budget - weight_cost, tm_max, x_item)

    single_f_step = (nf == 1)
    use_scratch_acc = (not single_f_step) and (x.dtype != jnp.float32)

    grid = (pl.cdiv(rows, tm), nf)                  # reduction (F) axis last

    # --- bf16 weights, F-chunk-major layout (contiguous per-step DMA slabs) ---
    w1c = w1.astype(jnp.bfloat16).reshape(nb, dg, nf, tf).transpose(2, 0, 1, 3)
    b1c = b1.astype(jnp.float32).reshape(nb, nf, tf).transpose(1, 0, 2)
    w2c = w2.astype(jnp.bfloat16).reshape(nb, nf, tf, dg).transpose(1, 0, 2, 3)
    b2c = b2.astype(jnp.float32)

    # --- VMEM limit (actual need + headroom, clamped to the per-gen budget) ---
    vmem_need = (
        2 * tm * D * x_item                        # x tile, double-buffered
        + 2 * tm * D * x_item                      # out tile, double-buffered
        + (tm * D * 4 if use_scratch_acc else 0)   # f32 accumulator scratch
        + weight_cost                              # W1/W2/b1/b2 chunks (2 bufs)
    )
    vmem_limit = int(min(budget, max(vmem_need + (8 << 20), 32 << 20)))

    # --- advisory cost estimate (weight traffic depends on residency) ---
    n_row_tiles = -(-rows // tm)
    weight_pass_bytes = 2 * (w1.size + w2.size)    # bf16 bytes for one full pass
    weight_traffic = weight_pass_bytes * (1 if single_f_step else n_row_tiles)
    cost = pl.CostEstimate(
        flops=4 * rows * dg * fg * nb,
        transcendentals=0,
        bytes_accessed=int(2 * rows * D * x_item + weight_traffic
                           + 4 * (b1.size + b2.size)),
    )

    kernel = functools.partial(
        _ffn_kernel, nb=nb, dg=dg,
        single_f_step=single_f_step, use_scratch_acc=use_scratch_acc)

    out = pl.pallas_call(
        kernel,
        out_shape=jax.ShapeDtypeStruct((rows, D), x.dtype),
        grid_spec=pltpu.PrefetchScalarGridSpec(
            num_scalar_prefetch=0,
            grid=grid,
            in_specs=[
                pl.BlockSpec((tm, D), lambda i, f: (i, 0)),             # x rows
                pl.BlockSpec((None, nb, dg, tf), lambda i, f: (f, 0, 0, 0)),  # W1 chunk
                pl.BlockSpec((None, nb, tf), lambda i, f: (f, 0, 0)),         # b1 chunk
                pl.BlockSpec((None, nb, tf, dg), lambda i, f: (f, 0, 0, 0)),  # W2 chunk
                pl.BlockSpec((nb, dg), lambda i, f: (0, 0)),                  # b2
            ],
            out_specs=pl.BlockSpec((tm, D), lambda i, f: (i, 0)),
            scratch_shapes=([pltpu.VMEM((tm, D), jnp.float32)]
                            if use_scratch_acc else []),
        ),
        compiler_params=pltpu.CompilerParams(
            dimension_semantics=("parallel", "arbitrary"),
            vmem_limit_bytes=vmem_limit,
        ),
        cost_estimate=cost,
    )(xf, w1c, b1c, w2c, b2c)

    return out.reshape(B, T, D)


# ---------------------------------------------------------------------------
# Params + pure-JAX reference
# ---------------------------------------------------------------------------
def init_params(key, d_model, d_ffn, nb=1, dtype=jnp.float32):
    """nn.Linear-style init: U(-1/sqrt(fan_in), 1/sqrt(fan_in)) per group."""
    dg, fg = d_model // nb, d_ffn // nb
    k1, k2, k3, k4 = jax.random.split(key, 4)
    lim1 = 1.0 / np.sqrt(dg)
    lim2 = 1.0 / np.sqrt(fg)
    w1 = jax.random.uniform(k1, (nb, dg, fg), dtype, -lim1, lim1)
    b1 = jax.random.uniform(k2, (nb, fg), dtype, -lim1, lim1)
    w2 = jax.random.uniform(k3, (nb, fg, dg), dtype, -lim2, lim2)
    b2 = jax.random.uniform(k4, (nb, dg), dtype, -lim2, lim2)
    return w1, b1, w2, b2


def _reference(x, w1, b1, w2, b2):
    """Pure-JAX f32 reference with identical semantics (dropout = identity)."""
    B, T, D = x.shape
    nb, dg, fg = w1.shape
    xg = x.reshape(B * T, nb, dg)
    h = jnp.maximum(jnp.einsum("rgd,gdf->rgf", xg, w1) + b1[None], 0.0)
    o = jnp.einsum("rgf,gfd->rgd", h, w2) + b2[None]
    return o.reshape(B, T, D)


def _check(y, x, w1, b1, w2, b2):
    # bf16 MXU inputs with f32 accumulation vs f32 reference -> loose tolerances.
    np.testing.assert_allclose(np.asarray(y),
                               np.asarray(_reference(x, w1, b1, w2, b2)),
                               rtol=2e-2, atol=2e-2)
    assert y.shape == x.shape and y.dtype == x.dtype


# ---------------------------------------------------------------------------
# Self-test
# ---------------------------------------------------------------------------
if __name__ == "__main__":
    key = jax.random.PRNGKey(0)

    # Config 1: tiny shapes matching the module defaults (nb=1 == nn.Linear).
    kx, kp, key = jax.random.split(key, 3)
    B, T, D, F, nb = 2, 8, 32, 64, 1
    x = jax.random.normal(kx, (B, T, D), jnp.float32)
    w1, b1, w2, b2 = init_params(kp, D, F, nb=nb)
    y = jax.block_until_ready(positionalwise_ffn(x, w1, b1, w2, b2))
    _check(y, x, w1, b1, w2, b2)

    # Config 2: grouped (nb=2) linears, fully VMEM-resident weights, single pass.
    kx, kp, key = jax.random.split(key, 3)
    B, T, D, F, nb = 4, 160, 256, 2048, 2
    x = jax.random.normal(kx, (B, T, D), jnp.float32)
    w1, b1, w2, b2 = init_params(kp, D, F, nb=nb)
    y = jax.block_until_ready(positionalwise_ffn(x, w1, b1, w2, b2))
    _check(y, x, w1, b1, w2, b2)

    # Config 3: force the F-chunked accumulation path + ragged last row tile
    # (exercises the nf > 1 branch that only triggers naturally at huge F).
    kx, kp, key = jax.random.split(key, 3)
    B, T, D, F, nb = 2, 160, 256, 512, 1      # rows=320 -> tiles 128,128,64(ragged)
    x = jax.random.normal(kx, (B, T, D), jnp.float32)
    w1, b1, w2, b2 = init_params(kp, D, F, nb=nb)
    y = jax.block_until_ready(
        positionalwise_ffn(x, w1, b1, w2, b2, tf_override=256, tm_override=128))
    _check(y, x, w1, b1, w2, b2)

    print("KERNEL_OK")
</pallas_src>

<mosaic_0001>
module attributes {stable_mosaic.version = 11 : i64} {
  func.func @_ffn_kernel(%arg0: i32, %arg1: i32, %arg2: memref<16x32xf32, #tpu.memory_space<vmem>>, %arg3: memref<1x1x32x64xbf16, #tpu.memory_space<vmem>>, %arg4: memref<1x1x64xf32, #tpu.memory_space<vmem>>, %arg5: memref<1x1x64x32xbf16, #tpu.memory_space<vmem>>, %arg6: memref<1x32xf32, #tpu.memory_space<vmem>>, %arg7: memref<16x32xf32, #tpu.memory_space<vmem>>) attributes {dimension_semantics = [#tpu.dimension_semantics<parallel>, #tpu.dimension_semantics<arbitrary>], iteration_bounds = array<i64: 1, 1>, scalar_prefetch = 0 : i64, scratch_operands = 0 : i64, tpu.core_type = #tpu.core_type<tc>, window_params = [{transform_indices = @transform_0, window_bounds = array<i64: 16, 32>}, {transform_indices = @transform_1, window_bounds = array<i64: 1, 1, 32, 64>}, {transform_indices = @transform_2, window_bounds = array<i64: 1, 1, 64>}, {transform_indices = @transform_3, window_bounds = array<i64: 1, 1, 64, 32>}, {pipeline_mode = #tpu.pipeline_mode<synchronous>, transform_indices = @transform_4, window_bounds = array<i64: 1, 32>}, {transform_indices = @transform_5, window_bounds = array<i64: 16, 32>}]} {
    %c0 = arith.constant 0 : index
    %c0_0 = arith.constant 0 : index
    %0 = vector.load %arg2[%c0, %c0_0] : memref<16x32xf32, #tpu.memory_space<vmem>>, vector<16x32xf32>
    %1 = arith.truncf %0 : vector<16x32xf32> to vector<16x32xbf16>
    %c0_1 = arith.constant 0 : index
    %c0_2 = arith.constant 0 : index
    %c0_3 = arith.constant 0 : index
    %c0_4 = arith.constant 0 : index
    %2 = vector.load %arg3[%c0_1, %c0_2, %c0_3, %c0_4] : memref<1x1x32x64xbf16, #tpu.memory_space<vmem>>, vector<1x1x32x64xbf16>
    %3 = vector.shape_cast %2 : vector<1x1x32x64xbf16> to vector<32x64xbf16>
    %cst = arith.constant dense<0.000000e+00> : vector<16x64xf32>
    %4 = tpu.matmul %1, %3, %cst {dimension_numbers = #tpu.dot_dimension_numbers<[1], [0], [0], [1], [0, 0, 1, 1], [], []>} : vector<16x32xbf16>, vector<32x64xbf16>, vector<16x64xf32> -> vector<16x64xf32>
    %c0_5 = arith.constant 0 : index
    %c0_6 = arith.constant 0 : index
    %c0_7 = arith.constant 0 : index
    %5 = vector.load %arg4[%c0_5, %c0_6, %c0_7] : memref<1x1x64xf32, #tpu.memory_space<vmem>>, vector<1x1x64xf32>
    %6 = vector.shape_cast %5 : vector<1x1x64xf32> to vector<64xf32>
    %7 = vector.shape_cast %6 : vector<64xf32> to vector<1x64xf32>
    %8 = vector.broadcast %7 : vector<1x64xf32> to vector<16x64xf32>
    %9 = arith.addf %4, %8 : vector<16x64xf32>
    %cst_8 = arith.constant 0.000000e+00 : f32
    %10 = vector.broadcast %cst_8 : f32 to vector<16x64xf32>
    %11 = arith.maximumf %9, %10 : vector<16x64xf32>
    %12 = arith.truncf %11 : vector<16x64xf32> to vector<16x64xbf16>
    %c0_9 = arith.constant 0 : index
    %c0_10 = arith.constant 0 : index
    %c0_11 = arith.constant 0 : index
    %c0_12 = arith.constant 0 : index
    %13 = vector.load %arg5[%c0_9, %c0_10, %c0_11, %c0_12] : memref<1x1x64x32xbf16, #tpu.memory_space<vmem>>, vector<1x1x64x32xbf16>
    %14 = vector.shape_cast %13 : vector<1x1x64x32xbf16> to vector<64x32xbf16>
    %cst_13 = arith.constant dense<0.000000e+00> : vector<16x32xf32>
    %15 = tpu.matmul %12, %14, %cst_13 {dimension_numbers = #tpu.dot_dimension_numbers<[1], [0], [0], [1], [0, 0, 1, 1], [], []>} : vector<16x64xbf16>, vector<64x32xbf16>, vector<16x32xf32> -> vector<16x32xf32>
    %c0_14 = arith.constant 0 : index
    %c0_15 = arith.constant 0 : index
    %16 = vector.load %arg6[%c0_14, %c0_15] : memref<1x32xf32, #tpu.memory_space<vmem>>, vector<1x32xf32>
    %17 = vector.shape_cast %16 : vector<1x32xf32> to vector<32xf32>
    %18 = vector.shape_cast %17 : vector<32xf32> to vector<1x32xf32>
    %19 = vector.broadcast %18 : vector<1x32xf32> to vector<16x32xf32>
    %20 = arith.addf %15, %19 : vector<16x32xf32>
    %c0_16 = arith.constant 0 : index
    %c0_17 = arith.constant 0 : index
    %21 = vector.load %arg7[%c0_16, %c0_17] : memref<16x32xf32, #tpu.memory_space<vmem>>, vector<16x32xf32>
    tpu.vector_store %arg7[%c0_16, %c0_17], %20 {strides = array<i32>} : memref<16x32xf32, #tpu.memory_space<vmem>>, vector<16x32xf32>,
    return
  }
  func.func @transform_0(%arg0: i32, %arg1: i32) -> (i32, i32) {
    %c0_i32 = arith.constant 0 : i32
    %c0_i32_0 = arith.constant 0 : i32
    return %arg0, %c0_i32 : i32, i32
  }
  func.func @transform_1(%arg0: i32, %arg1: i32) -> (i32, i32, i32, i32) {
    %c0_i32 = arith.constant 0 : i32
    %c0_i32_0 = arith.constant 0 : i32
    %c0_i32_1 = arith.constant 0 : i32
    %c0_i32_2 = arith.constant 0 : i32
    return %arg1, %c0_i32, %c0_i32_0, %c0_i32_1 : i32, i32, i32, i32
  }
  func.func @transform_2(%arg0: i32, %arg1: i32) -> (i32, i32, i32) {
    %c0_i32 = arith.constant 0 : i32
    %c0_i32_0 = arith.constant 0 : i32
    %c0_i32_1 = arith.constant 0 : i32
    return %arg1, %c0_i32, %c0_i32_0 : i32, i32, i32
  }
  func.func @transform_3(%arg0: i32, %arg1: i32) -> (i32, i32, i32, i32) {
    %c0_i32 = arith.constant 0 : i32
    %c0_i32_0 = arith.constant 0 : i32
    %c0_i32_1 = arith.constant 0 : i32
    %c0_i32_2 = arith.constant 0 : i32
    return %arg1, %c0_i32, %c0_i32_0, %c0_i32_1 : i32, i32, i32, i32
  }
  func.func @transform_4(%arg0: i32, %arg1: i32) -> (i32, i32) {
    %c0_i32 = arith.constant 0 : i32
    %c0_i32_0 = arith.constant 0 : i32
    %c0_i32_1 = arith.constant 0 : i32
    return %c0_i32, %c0_i32_0 : i32, i32
  }
  func.func @transform_5(%arg0: i32, %arg1: i32) -> (i32, i32) {
    %c0_i32 = arith.constant 0 : i32
    %c0_i32_0 = arith.constant 0 : i32
    return %arg0, %c0_i32 : i32, i32
  }
}

</mosaic_0001>

<bundles_post_ra>
// kernel: positionalwise_ffn.1
= control target key start
LH: loop header
LB: loop body
LE: loop exit
PB: predicated region body
PF: predicated region fallthrough
CT: control target
= control target key end

     0   :  { %v271_v1 = vmov 0.0   ;;  %vm272_vm0 = vmmov 0   ;;  %vm48_vm1 = vcmask 261120   ;;  %s351_s0 = inlined_call_operand.vmem [shape: f32[16,32], index: 0, kind: input, shape index: {}]   ;;  %s352_s1 = inlined_call_operand.vmem [shape: bf16[1,1,32,64], index: 1, kind: input, shape index: {}]   ;;  %s353_s2 = inlined_call_operand.vmem [shape: f32[1,1,64], index: 2, kind: input, shape index: {}]   ;;  %s354_s3 = inlined_call_operand.vmem [shape: bf16[1,1,64,32], index: 3, kind: input, shape index: {}]   ;;  %s355_s4 = inlined_call_operand.vmem [shape: f32[1,32], index: 4, kind: input, shape index: {}]   ;;  %s356_s5 = inlined_call_operand.hbm [shape: f32[16,32], index: 5, kind: output, shape index: {}]  }
   0x1   :  { %v241_v0 = vld [vmem:[%s352_s1] sm:$0xff]   ;;  %216 = vmatprep.subr.bf16.mxu0 %v271_v1  ;;  %v242_v2 = vld [vmem:[%s352_s1 + $0x8] sm:$0xff]   ;;  %224 = vmatprep.subr.bf16.mxu1 %v271_v1 }
   0x2   :  { %217 = vmatpush3.bf16.msra.mxu0 %v241_v0  ;;  %220 = vmatprep.mubr.msk.bf16.mxu0 %vm272_vm0, %v271_v1  ;;  %v22_v3 = vld [vmem:[%s351_s0] sm:$0xff]  ;;  %v23_v4 = vld [vmem:[%s351_s0 + $0x8] sm:$0xff] }
   0x3   :  { %218 = vmatprep.subr.bf16.mxu0 %v271_v1  ;;  %v243_v5 = vld [vmem:[%s354_s3] sm:$0xff]   ;;  %232 = vmatprep.mubr.msk.bf16.mxu1 %vm272_vm0, %v271_v1  ;;  %v244_v6 = vld [vmem:[%s354_s3 + $0x8] sm:$0xff]   ;;  %v24_v7 = vpack.c.bf16 %v23_v4, %v22_v3 }
   0x4   :  { %225 = vmatpush3.bf16.msra.mxu1 %v243_v5 }
   0x5   :  { %226 = vmatprep.subr.bf16.mxu1 %v271_v1 }
   0x6   :  { %219 = vmatpush3.bf16.msra.mxu0 %v242_v2 }
   0x7   :  { %10 = vsyncpa [#allocation3], 0  ;;  %v245_v8 = vld [vmem:[%s354_s3 + $0x10] sm:$0xff]   ;;  %v246_v9 = vld [vmem:[%s354_s3 + $0x18] sm:$0xff]   ;;  %vm135_vm2 = vcmask 523264   ;;  %s273_s3 = smov [#allocation2]  }
   0x8   :  { %227 = vmatpush3.bf16.msra.mxu1 %v244_v6  ;;  %v198_v10 = vld [vmem:[%s353_s2] ss:$0 sm:$0xff]  ;;  %s187_s11 = sshll.u32 %s273_s3, 4  ;;  %s188_s11 = int_to_ptr.vmem [resolvable:$true] %s187_s11 }
   0x9   :  { %221 = vmatmul.mubr.msk.bf16.vlgmr.msra.gmra.mrb[0].mxu0 %vm48_vm1, %v24_v7  ;;  %228 = vmatprep.subr.bf16.mxu1 %v271_v1  ;;  %v202_v20 = vld [vmem:[%s355_s4] ss:$0 sm:$0xff]  ;;  %s247_s2 = scalar_lea.vmem %s188_s11, 256  ;;  %p252_p1 = scmp.lt.s32.totalorder %s188_s11, %s188_s11 }
   0xa   :  { %p248_p0 = scmp.ne.s32.totalorder %s188_s11, %s247_s2  ;;  %p253_p2 = scmp.lt.s32.totalorder %s247_s2, %s247_s2 }
   0xc   :  { %229 = vmatpush3.bf16.msra.mxu1 %v245_v8  ;;  %p254_p3 = por %p253_p2, %p252_p1 }
   0xd   :  { %230 = vmatprep.subr.bf16.mxu1 %v271_v1 }
   0xe   :  { %p255_p4 = pnand %p254_p3, %p248_p0 }
  0x10   :  { %231 = vmatpush3.bf16.msra.mxu1 %v246_v9 }
  0xdc   :  { %v86_v11 = vpop.f32.mrb[0].mxu0 }
  0xdd   :  { %v87_v12 = vadd.f32 %v198_v10, %v86_v11  ;;  %v222_v13 = vpop.f32.mrb[1].mxu0 }
  0xde   :  { %v89_v14 = vpop.f32.mrb[2].mxu0 }
  0xdf   :  { %v90_v15 = vadd.f32 %v198_v10, %v89_v14  ;;  %v223_v16 = vpop.f32.mrb[3].mxu0  ;;  %v93_v17 = vmax.f32 %v87_v12, 0.0 }
  0xe1   :  { %v94_v18 = vmax.f32 %v90_v15, 0.0 }
  0xe3   :  { %v95_v19 = vpack.c.bf16 %v94_v18, %v93_v17 }
  0xe5   :  { %233 = vmatmul.mubr.msk.bf16.vlgmr.msra.gmra.mrb[0].mxu1 %vm135_vm2, %v95_v19 }
 0x1b8   :  { %v173_v21 = vpop.f32.mrb[0].mxu1 }
 0x1b9   :  { %v174_v22 = vadd.f32 %v202_v20, %v173_v21  ;;  %v234_v23 = vpop.f32.mrb[1].mxu1 }
 0x1ba   :  { %v176_v24 = vpop.f32.mrb[2].mxu1 }
 0x1bb   :  { %180 = vst.msk [vmem:[#allocation2] sm:$0xff] %vm48_vm1, %v174_v22  ;;  %v177_v25 = vadd.f32 %v202_v20, %v176_v24  ;;  %v235_v26 = vpop.f32.mrb[3].mxu1 }
 0x1bd   :  { %181 = vst.msk [vmem:[#allocation2 + $0x8] sm:$0xff] %vm48_vm1, %v177_v25 }
 0x1be   :  { %258 = shalt.err (!%p255_p4)
}
 0x1bf   :  { %s259_s13 = scalar_lea.hbm %s356_s5, 256 }
 0x1c0   :  { %p260_p5 = scmp.ne.s32.totalorder %s356_s5, %s259_s13  ;;  %p263_p6 = scmp.lt.u32.totalorder %s259_s13, %s356_s5 }
 0x1c2   :  { %p265_p7 = pnand %p263_p6, %p260_p5 }
 0x1c4   :  { %268 = shalt.err (!%p265_p7)
}
 0x1c5   :  { %s274_s18 = smov 128   ;;  %s275_s19 = smov 8  }
 0x1c6   :  { %193 = dma.vmem_to_hbm [thread:$0]  %s188_s11, 256, %s356_s5, [#allocation3], %s274_s18, %s274_s18, %s275_s19  }
 0x1c7   :  { %269 = dma.done.wait [#allocation3], 256  }
 0x1c8   :  { %270 = vsyncadd [#allocation3], 4294967040 }
 0x1c9   :  { %197 = vsyncpa [#allocation3], 1 }

</bundles_post_ra>
